<compile_context>
chip_gen: v6e
topology: v6e:2x2x1
jax: 0.10.0
libtpu: 0.0.40
codegen_flags: <defaults>
</compile_context>

<pallas_src>
import math

import jax
import jax.numpy as jnp
import numpy as np
from jax import lax
from jax.experimental import pallas as pl
from jax.experimental.pallas import tpu as pltpu


def fixed_embedding_table(c_in, d_model):
    """Same construction as FixedEmbedding.__init__ (sinusoidal, frozen)."""
    pos = jnp.arange(c_in, dtype=jnp.float32)[:, None]                      # (c_in, 1)
    div = jnp.exp(jnp.arange(0, d_model, 2, dtype=jnp.float32)
                  * (-math.log(10000.0) / d_model))                         # (d_model/2,)
    w = jnp.zeros((c_in, d_model), jnp.float32)
    w = w.at[:, 0::2].set(jnp.sin(pos * div))
    w = w.at[:, 1::2].set(jnp.cos(pos * div))
    return w


def _tensorcores_per_chip():
    """Best-effort TensorCore count behind one JAX TPU device (1: v5e/v6e, 2: v7x)."""
    try:
        info = pltpu.get_tpu_info()
        for attr in ("num_cores", "core_count", "num_tensorcores", "tensorcore_count"):
            n = getattr(info, attr, None)
            if n is not None:
                return min(2, max(1, int(n)))
        ver = getattr(info, "chip_version", None)
        if ver is not None and "7" in str(ver):
            return 2
    except Exception:
        pass
    try:
        kind = jax.devices()[0].device_kind.lower()
        if "v7" in kind or "7x" in kind:
            return 2
    except Exception:
        pass
    return 1


def _make_kernel(BB, S, F, fea_num, d_model, t_pad):
    fb = fea_num * BB

    def kernel(x_ref, tab_ref, wbd_ref, bias_ref, o_ref):
        # x_ref:   (BB*S, F) int32 indices, already offset into the concat-table rows
        # tab_ref: (t_pad, d_model) concatenated embedding tables
        # wbd_ref: (3*fea_num*BB, BB*S) block-diagonal stacked conv weights,
        #          rows ordered (tap, out_channel, batch)
        # bias_ref:(fea_num*BB, 1) conv bias per (out_channel, batch) row
        # o_ref:   (BB, fea_num*d_model) lane-dense output block
        idx = x_ref[...]                                                     # (BB*S, F)

        # --- merged embedding gather: OR-built multi-hot, single cast, one MXU matmul ---
        iota = lax.broadcasted_iota(jnp.int32, (BB * S, t_pad), 1)
        hot = iota == idx[:, 0:1]
        for c in range(1, F):
            hot = hot | (iota == idx[:, c:c + 1])                            # disjoint ranges
        emb = jnp.dot(hot.astype(jnp.float32), tab_ref[...],
                      preferred_element_type=jnp.float32)                    # (BB*S, d_model)

        # --- circular Conv1d(k=3, pad=1): all BB batches & 3 taps in ONE matmul ---
        # roll-commute identity handles the circular shifts after the matmul (XLU, cheap).
        p = jnp.dot(wbd_ref[...], emb,
                    preferred_element_type=jnp.float32)                      # (3*fb, d_model)
        conv = (pltpu.roll(p[0:fb], shift=1, axis=1)
                + p[fb:2 * fb]
                + pltpu.roll(p[2 * fb:3 * fb], shift=d_model - 1, axis=1)
                + bias_ref[...])                                             # (fb, d_model)

        # rows of `conv` are (out_channel, batch): direct lane-slice stores, no concat temp.
        for c in range(fea_num):
            o_ref[:, c * d_model:(c + 1) * d_model] = conv[c * BB:(c + 1) * BB, :]

    return kernel


def temporal_embedding(x, tables, conv_w, conv_b, *, block_b=None, block_b_cap=16):
    """x: (B, S, F) int indices. tables: list of (size, d_model) f32 tables in column order
    [month, day, weekday, hour, (minute if freq='t')]. conv_w: (fea_num, S, 3) f32
    (PyTorch OIH layout). conv_b: (fea_num,) f32. Returns (B, fea_num, d_model) f32."""
    B, S, F = x.shape
    assert F == len(tables), "one embedding table per time-feature column"
    d_model = int(tables[0].shape[1])
    fea_num = int(conv_w.shape[0])
    assert conv_w.shape[1] == S, "Conv1d in_channels (c_in) must equal seq length S"

    # Generation-aware block size: exactly one grid step per TensorCore, capped so the
    # O(BB^2 * S) block-diagonal conv weight stays tiny (v7x VMEM is only 64 MiB).
    if block_b is None:
        BB = max(1, min(int(block_b_cap), -(-B // _tensorcores_per_chip())))
    else:
        BB = int(block_b)
    B_pad = ((B + BB - 1) // BB) * BB

    # --- indices: clamp per feature, fold per-feature row offsets, flatten (host side) ---
    sizes = np.array([int(t.shape[0]) for t in tables], np.int32)
    offsets = np.concatenate([[0], np.cumsum(sizes)[:-1]]).astype(np.int32)
    x_i = jnp.clip(x.astype(jnp.int32), 0, jnp.asarray(sizes - 1))
    x_i = x_i + jnp.asarray(offsets)[None, None, :]
    x_pad = jnp.pad(x_i, ((0, B_pad - B), (0, 0), (0, 0)))
    x_flat = x_pad.reshape(B_pad * S, F)                          # one wide index load/step

    # --- concatenated (sublane-padded) embedding table ---
    t_total = int(sizes.sum())
    t_pad = ((t_total + 7) // 8) * 8
    cat_table = jnp.concatenate([t.astype(jnp.float32) for t in tables], axis=0)
    cat_table = jnp.pad(cat_table, ((0, t_pad - t_total), (0, 0)))   # (t_pad, d_model)

    # Block-diagonal stacked conv weights: Wbd[k, c, b, b', s] = W[c, s, k] * delta(b, b'),
    # flattened to (3*fea_num*BB, BB*S) with rows ordered (tap, out_channel, batch).
    eye = jnp.eye(BB, dtype=jnp.float32)
    wbd_blocks = []
    for k in range(3):
        wk = conv_w[:, :, k].astype(jnp.float32)                  # (fea_num, S)
        blk = jnp.einsum('cs,be->cbes', wk, eye)                  # (fea_num, BB, BB, S)
        wbd_blocks.append(blk.reshape(fea_num * BB, BB * S))
    wbd = jnp.concatenate(wbd_blocks, axis=0)                     # (3*fea_num*BB, BB*S)

    # Bias per (out_channel, batch) row, added once inside the kernel before the stores.
    bias_col = jnp.repeat(conv_b.astype(jnp.float32), BB).reshape(fea_num * BB, 1)

    kernel = _make_kernel(BB, S, F, fea_num, d_model, t_pad)

    out_flat = pl.pallas_call(
        kernel,
        out_shape=jax.ShapeDtypeStruct((B_pad, fea_num * d_model), jnp.float32),
        grid_spec=pltpu.PrefetchScalarGridSpec(
            num_scalar_prefetch=0,
            grid=(B_pad // BB,),
            in_specs=[
                pl.BlockSpec((BB * S, F), lambda i: (i, 0)),                 # indices
                # Grid-invariant inputs (constant index_map); small enough that default
                # double-buffering is harmless. If tables / wbd ever grow, switch these
                # to pipeline_mode=pl.Buffered(1) and set vmem_limit_bytes explicitly.
                pl.BlockSpec((t_pad, d_model), lambda i: (0, 0)),            # concat table
                pl.BlockSpec((3 * fea_num * BB, BB * S), lambda i: (0, 0)),  # stacked conv W
                pl.BlockSpec((fea_num * BB, 1), lambda i: (0, 0)),           # bias column
            ],
            out_specs=pl.BlockSpec((BB, fea_num * d_model), lambda i: (i, 0)),
        ),
        compiler_params=pltpu.CompilerParams(dimension_semantics=("parallel",)),
    )(x_flat, cat_table, wbd, bias_col)

    return out_flat[:B].reshape(B, fea_num, d_model)


def reference_forward(x, tables, conv_w, conv_b):
    """Pure-JAX reference mirroring the PyTorch forward."""
    emb = jnp.zeros(x.shape[:2] + (tables[0].shape[1],), jnp.float32)
    for col, t in enumerate(tables):
        emb = emb + t[x[:, :, col]]
    # circular pad along the length (d_model) axis, then valid conv (NCH layout)
    padded = jnp.concatenate([emb[:, :, -1:], emb, emb[:, :, :1]], axis=-1)
    out = lax.conv_general_dilated(
        padded, conv_w, window_strides=(1,), padding="VALID",
        dimension_numbers=("NCH", "OIH", "NCH"))
    return out + conv_b[None, :, None]


if __name__ == "__main__":
    # Shapes: batch=16, seq (== conv c_in)=8, time features=4 (freq='h'),
    # conv out channels fea_num=4, d_model=32 -> lane-dense 128-wide output.
    B, S, F = 16, 8, 4
    fea_num, d_model = 4, 32

    # Fixed sinusoidal embedding tables (month=13, day=32, weekday=7, hour=24).
    tables = [
        fixed_embedding_table(13, d_model),   # month   -> x[:, :, 0]
        fixed_embedding_table(32, d_model),   # day     -> x[:, :, 1]
        fixed_embedding_table(7, d_model),    # weekday -> x[:, :, 2]
        fixed_embedding_table(24, d_model),   # hour    -> x[:, :, 3]
    ]
    # freq='t' (minute embedding) is supported by appending its table and a 5th index column.

    key = jax.random.PRNGKey(0)
    k_m, k_d, k_w, k_h, k_cw, k_cb = jax.random.split(key, 6)
    x = jnp.stack([
        jax.random.randint(k_m, (B, S), 0, 13),
        jax.random.randint(k_d, (B, S), 0, 32),
        jax.random.randint(k_w, (B, S), 0, 7),
        jax.random.randint(k_h, (B, S), 0, 24),
    ], axis=-1).astype(jnp.int32)                                   # (B, S, F)

    # Deterministic Conv1d params (PyTorch layout: (out_ch, in_ch, k)).
    bound = 1.0 / math.sqrt(S * 3)
    conv_w = jax.random.uniform(k_cw, (fea_num, S, 3), jnp.float32, -bound, bound)
    conv_b = jax.random.uniform(k_cb, (fea_num,), jnp.float32, -bound, bound)

    out = temporal_embedding(x, tables, conv_w, conv_b)
    out = jax.block_until_ready(out)

    ref = reference_forward(x, tables, conv_w, conv_b)
    np.testing.assert_allclose(np.asarray(out), np.asarray(ref), rtol=1e-5, atol=1e-5)
    assert out.shape == (B, fea_num, d_model)

    print("KERNEL_OK")
</pallas_src>

<mosaic_0001>
module attributes {stable_mosaic.version = 11 : i64} {
  func.func @kernel(%arg0: i32, %arg1: memref<128x4xi32, #tpu.memory_space<vmem>>, %arg2: memref<80x32xf32, #tpu.memory_space<vmem>>, %arg3: memref<192x128xf32, #tpu.memory_space<vmem>>, %arg4: memref<64x1xf32, #tpu.memory_space<vmem>>, %arg5: memref<16x128xf32, #tpu.memory_space<vmem>>) attributes {dimension_semantics = [#tpu.dimension_semantics<parallel>], iteration_bounds = array<i64: 1>, scalar_prefetch = 0 : i64, scratch_operands = 0 : i64, tpu.core_type = #tpu.core_type<tc>, window_params = [{transform_indices = @transform_0, window_bounds = array<i64: 128, 4>}, {pipeline_mode = #tpu.pipeline_mode<synchronous>, transform_indices = @transform_1, window_bounds = array<i64: 80, 32>}, {pipeline_mode = #tpu.pipeline_mode<synchronous>, transform_indices = @transform_2, window_bounds = array<i64: 192, 128>}, {pipeline_mode = #tpu.pipeline_mode<synchronous>, transform_indices = @transform_3, window_bounds = array<i64: 64, 1>}, {transform_indices = @transform_4, window_bounds = array<i64: 16, 128>}]} {
    %c0 = arith.constant 0 : index
    %c0_0 = arith.constant 0 : index
    %0 = vector.load %arg1[%c0, %c0_0] : memref<128x4xi32, #tpu.memory_space<vmem>>, vector<128x4xi32>
    %1 = tpu.iota {dimensions = array<i32: 1>} : vector<128x80xi32>
    %2 = vector.extract_strided_slice %0 {offsets = [0, 0], sizes = [128, 1], strides = [1, 1]} : vector<128x4xi32> to vector<128x1xi32>
    %3 = vector.broadcast %2 : vector<128x1xi32> to vector<128x80xi32>
    %4 = arith.cmpi eq, %1, %3 : vector<128x80xi32>
    %5 = vector.extract_strided_slice %0 {offsets = [0, 1], sizes = [128, 1], strides = [1, 1]} : vector<128x4xi32> to vector<128x1xi32>
    %6 = vector.broadcast %5 : vector<128x1xi32> to vector<128x80xi32>
    %7 = arith.cmpi eq, %1, %6 : vector<128x80xi32>
    %8 = arith.ori %4, %7 : vector<128x80xi1>
    %9 = vector.extract_strided_slice %0 {offsets = [0, 2], sizes = [128, 1], strides = [1, 1]} : vector<128x4xi32> to vector<128x1xi32>
    %10 = vector.broadcast %9 : vector<128x1xi32> to vector<128x80xi32>
    %11 = arith.cmpi eq, %1, %10 : vector<128x80xi32>
    %12 = arith.ori %8, %11 : vector<128x80xi1>
    %13 = vector.extract_strided_slice %0 {offsets = [0, 3], sizes = [128, 1], strides = [1, 1]} : vector<128x4xi32> to vector<128x1xi32>
    %14 = vector.broadcast %13 : vector<128x1xi32> to vector<128x80xi32>
    %15 = arith.cmpi eq, %1, %14 : vector<128x80xi32>
    %16 = arith.ori %12, %15 : vector<128x80xi1>
    %17 = arith.extui %16 : vector<128x80xi1> to vector<128x80xi32>
    %18 = arith.sitofp %17 : vector<128x80xi32> to vector<128x80xf32>
    %c0_1 = arith.constant 0 : index
    %c0_2 = arith.constant 0 : index
    %19 = vector.load %arg2[%c0_1, %c0_2] : memref<80x32xf32, #tpu.memory_space<vmem>>, vector<80x32xf32>
    %cst = arith.constant dense<0.000000e+00> : vector<128x32xf32>
    %20 = tpu.matmul %18, %19, %cst {dimension_numbers = #tpu.dot_dimension_numbers<[1], [0], [0], [1], [0, 0, 1, 1], [], []>} : vector<128x80xf32>, vector<80x32xf32>, vector<128x32xf32> -> vector<128x32xf32>
    %c0_3 = arith.constant 0 : index
    %c0_4 = arith.constant 0 : index
    %21 = vector.load %arg3[%c0_3, %c0_4] : memref<192x128xf32, #tpu.memory_space<vmem>>, vector<192x128xf32>
    %cst_5 = arith.constant dense<0.000000e+00> : vector<192x32xf32>
    %22 = tpu.matmul %21, %20, %cst_5 {dimension_numbers = #tpu.dot_dimension_numbers<[1], [0], [0], [1], [0, 0, 1, 1], [], []>} : vector<192x128xf32>, vector<128x32xf32>, vector<192x32xf32> -> vector<192x32xf32>
    %23 = vector.extract_strided_slice %22 {offsets = [0, 0], sizes = [64, 32], strides = [1, 1]} : vector<192x32xf32> to vector<64x32xf32>
    %c1_i32 = arith.constant 1 : i32
    %24 = tpu.dynamic_rotate %23 by %c1_i32 dim 1 : vector<64x32xf32>, i32 -> vector<64x32xf32>
    %25 = vector.extract_strided_slice %22 {offsets = [64, 0], sizes = [64, 32], strides = [1, 1]} : vector<192x32xf32> to vector<64x32xf32>
    %26 = arith.addf %24, %25 : vector<64x32xf32>
    %27 = vector.extract_strided_slice %22 {offsets = [128, 0], sizes = [64, 32], strides = [1, 1]} : vector<192x32xf32> to vector<64x32xf32>
    %c31_i32 = arith.constant 31 : i32
    %28 = tpu.dynamic_rotate %27 by %c31_i32 dim 1 : vector<64x32xf32>, i32 -> vector<64x32xf32>
    %29 = arith.addf %26, %28 : vector<64x32xf32>
    %c0_6 = arith.constant 0 : index
    %c0_7 = arith.constant 0 : index
    %30 = vector.load %arg4[%c0_6, %c0_7] : memref<64x1xf32, #tpu.memory_space<vmem>>, vector<64x1xf32>
    %31 = vector.broadcast %30 : vector<64x1xf32> to vector<64x32xf32>
    %32 = arith.addf %29, %31 : vector<64x32xf32>
    %33 = vector.extract_strided_slice %32 {offsets = [0, 0], sizes = [16, 32], strides = [1, 1]} : vector<64x32xf32> to vector<16x32xf32>
    %c0_8 = arith.constant 0 : index
    %c0_9 = arith.constant 0 : index
    %34 = vector.load %arg5[%c0_8, %c0_9] : memref<16x128xf32, #tpu.memory_space<vmem>>, vector<16x32xf32>
    tpu.vector_store %arg5[%c0_8, %c0_9], %33 {strides = array<i32>} : memref<16x128xf32, #tpu.memory_space<vmem>>, vector<16x32xf32>,
    %35 = vector.extract_strided_slice %32 {offsets = [16, 0], sizes = [16, 32], strides = [1, 1]} : vector<64x32xf32> to vector<16x32xf32>
    %c0_10 = arith.constant 0 : index
    %c32 = arith.constant 32 : index
    %36 = vector.load %arg5[%c0_10, %c32] : memref<16x128xf32, #tpu.memory_space<vmem>>, vector<16x32xf32>
    tpu.vector_store %arg5[%c0_10, %c32], %35 {strides = array<i32>} : memref<16x128xf32, #tpu.memory_space<vmem>>, vector<16x32xf32>,
    %37 = vector.extract_strided_slice %32 {offsets = [32, 0], sizes = [16, 32], strides = [1, 1]} : vector<64x32xf32> to vector<16x32xf32>
    %c0_11 = arith.constant 0 : index
    %c64 = arith.constant 64 : index
    %38 = vector.load %arg5[%c0_11, %c64] : memref<16x128xf32, #tpu.memory_space<vmem>>, vector<16x32xf32>
    tpu.vector_store %arg5[%c0_11, %c64], %37 {strides = array<i32>} : memref<16x128xf32, #tpu.memory_space<vmem>>, vector<16x32xf32>,
    %39 = vector.extract_strided_slice %32 {offsets = [48, 0], sizes = [16, 32], strides = [1, 1]} : vector<64x32xf32> to vector<16x32xf32>
    %c0_12 = arith.constant 0 : index
    %c96 = arith.constant 96 : index
    %40 = vector.load %arg5[%c0_12, %c96] : memref<16x128xf32, #tpu.memory_space<vmem>>, vector<16x32xf32>
    tpu.vector_store %arg5[%c0_12, %c96], %39 {strides = array<i32>} : memref<16x128xf32, #tpu.memory_space<vmem>>, vector<16x32xf32>,
    return
  }
  func.func @transform_0(%arg0: i32) -> (i32, i32) {
    %c0_i32 = arith.constant 0 : i32
    %c0_i32_0 = arith.constant 0 : i32
    return %arg0, %c0_i32 : i32, i32
  }
  func.func @transform_1(%arg0: i32) -> (i32, i32) {
    %c0_i32 = arith.constant 0 : i32
    %c0_i32_0 = arith.constant 0 : i32
    %c0_i32_1 = arith.constant 0 : i32
    return %c0_i32, %c0_i32_0 : i32, i32
  }
  func.func @transform_2(%arg0: i32) -> (i32, i32) {
    %c0_i32 = arith.constant 0 : i32
    %c0_i32_0 = arith.constant 0 : i32
    %c0_i32_1 = arith.constant 0 : i32
    return %c0_i32, %c0_i32_0 : i32, i32
  }
  func.func @transform_3(%arg0: i32) -> (i32, i32) {
    %c0_i32 = arith.constant 0 : i32
    %c0_i32_0 = arith.constant 0 : i32
    %c0_i32_1 = arith.constant 0 : i32
    return %c0_i32, %c0_i32_0 : i32, i32
  }
  func.func @transform_4(%arg0: i32) -> (i32, i32) {
    %c0_i32 = arith.constant 0 : i32
    %c0_i32_0 = arith.constant 0 : i32
    return %arg0, %c0_i32 : i32, i32
  }
}

</mosaic_0001>

<bundles_post_ra>
// kernel: tpu_custom_call.1
= control target key start
LH: loop header
LB: loop body
LE: loop exit
PB: predicated region body
PF: predicated region fallthrough
CT: control target
= control target key end

     0   :  { %v1397_v2 = vmov 1   ;;  %v1398_v3 = vmov 0   ;;  %s2072_s0 = inlined_call_operand.vmem [shape: s32[128,4], index: 0, kind: input, shape index: {}]   ;;  %s2073_s1 = inlined_call_operand.vmem [shape: f32[80,32], index: 1, kind: input, shape index: {}]   ;;  %s2074_s2 = inlined_call_operand.vmem [shape: f32[192,128], index: 2, kind: input, shape index: {}]   ;;  %s2075_s3 = inlined_call_operand.vmem [shape: f32[64,1], index: 3, kind: input, shape index: {}]   ;;  %s2076_s4 = inlined_call_operand.hbm [shape: f32[16,128], index: 4, kind: output, shape index: {}]  }
   0x1   :  { %v19_v0 = vld [vmem:[%s2072_s0 + $0x8] sm:$0xff]  ;;  %v1443_v1 = vld [vmem:[%s2072_s0] sm:$0xff]  ;;  %1335 = vset.pattern.permute.xlu0 %v1397_v2  ;;  %1336 = vset.pattern.permute.xlu1 %v1398_v3  ;;  %v21_v4 = vld [vmem:[%s2072_s0 + $0x18] sm:$0xff] }
   0x2   :  { %40 = vperm.xlu1 %1336, %v19_v0   ;;  %101 = vperm.xlu0 %1335, %v1443_v1  }
   0x3   :  { %9 = vsyncpa [#allocation3], 0  ;;  %v1455_v5 = vld [vmem:[%s2072_s0 + $0x20] sm:$0xff]  ;;  %v1399_v6 = vmov 2   ;;  %v1463_v7 = vld [vmem:[%s2072_s0 + $0x10] sm:$0xff]  ;;  %v1400_v8 = vmov 3   ;;  %v34_v47 = vlaneseq }
   0x4   :  { %v1471_v9 = vld [vmem:[%s2072_s0 + $0x28] sm:$0xff]  ;;  %v1478_v10 = vld [vmem:[%s2072_s0 + $0x40] sm:$0xff]  ;;  %v1484_v11 = vld [vmem:[%s2072_s0 + $0x58] sm:$0xff]  ;;  %v1401_v61 = vmov 0.0   ;;  %s1403_s10 = smov 31   ;;  %s1404_s22 = smov 30  }
   0x5   :  { %v381_v12 = vld [vmem:[%s2073_s1 + $0x48] sm:$0xff]  ;;  %v380_v13 = vld [vmem:[%s2073_s1 + $0x40] sm:$0xff]  ;;  %v1503_v14 = vld [vmem:[%s2072_s0 + $0x38] sm:$0xff]  ;;  %v1623_v50 = vand.u32 127, %v34_v47  ;;  %s1406_s23 = smov 1   ;;  %s1407_s24 = smov 33  }
   0x6   :  { %1337 = vset.pattern.permute.xlu1 %v1397_v2  ;;  %110 = vperm.xlu0 %1335, %v21_v4   ;;  %v379_v15 = vld [vmem:[%s2073_s1 + $0x38] sm:$0xff]  ;;  %v378_v16 = vld [vmem:[%s2073_s1 + $0x30] sm:$0xff]  ;;  %v377_v18 = vld [vmem:[%s2073_s1 + $0x28] sm:$0xff]  ;;  %s1408_s25 = smov 65   ;;  %s1409_s26 = smov [#allocation2]  }
   0x7   :  { %104 = vperm.xlu1 %1337, %v19_v0   ;;  %1176 = vmatprep.subr.mxu0 %v381_v12  ;;  %v1515_v17 = vld [vmem:[%s2072_s0 + $0x50] sm:$0xff]  ;;  %v376_v19 = vld [vmem:[%s2073_s1 + $0x20] sm:$0xff]  ;;  %v1528_v20 = vld [vmem:[%s2072_s0 + $0x68] sm:$0xff]  ;;  %s1067_s27 = sshll.u32 %s1409_s26, 4  ;;  %s1068_s27 = int_to_ptr.vmem [resolvable:$true] %s1067_s27 }
   0x8   :  { %1177 = vmatpush3.msra.mxu0 %v381_v12  ;;  %v375_v21 = vld [vmem:[%s2073_s1 + $0x18] sm:$0xff]  ;;  %v374_v22 = vld [vmem:[%s2073_s1 + $0x10] sm:$0xff]  ;;  %v373_v23 = vld [vmem:[%s2073_s1 + $0x8] sm:$0xff]  ;;  %s1375_s28 = scalar_lea.vmem %s1068_s27, 256  ;;  %p1380_p1 = scmp.lt.s32.totalorder %s1068_s27, %s1068_s27 }
   0x9   :  { %1178 = vmatprep.subr.mxu0 %v380_v13  ;;  %v372_v24 = vld [vmem:[%s2073_s1] sm:$0xff]  ;;  %v1561_v25 = vld [vmem:[%s2072_s0 + $0x70] sm:$0xff]  ;;  %v27_v27 = vld [vmem:[%s2072_s0 + $0x48] sm:$0xff]  ;;  %p1376_p0 = scmp.ne.s32.totalorder %s1068_s27, %s1375_s28  ;;  %p1381_p2 = scmp.lt.s32.totalorder %s1375_s28, %s1375_s28 }
   0xa   :  { %113 = vperm.xlu0 %1335, %v1455_v5   ;;  %1179 = vmatpush3.msra.mxu0 %v380_v13  ;;  %v24_v26 = vld [vmem:[%s2072_s0 + $0x30] sm:$0xff]  ;;  %v1578_v28 = vld [vmem:[%s2072_s0 + $0x78] sm:$0xff]  ;;  %v30_v40 = vld [vmem:[%s2072_s0 + $0x60] sm:$0xff] }
   0xb   :  { %1338 = vset.pattern.permute.xlu1 %v1399_v6  ;;  %1180 = vmatprep.subr.mxu0 %v379_v15  ;;  %p1382_p3 = por %p1381_p2, %p1380_p1 }
   0xc   :  { %181 = vperm.xlu1 %1338, %v1443_v1   ;;  %1181 = vmatpush3.msra.mxu0 %v379_v15 }
   0xd   :  { %1182 = vmatprep.subr.mxu0 %v378_v16  ;;  %p1383_p4 = pnand %p1382_p3, %p1376_p0 }
   0xe   :  { %1345 = vset.pattern.permute.xlu0 %v1400_v8  ;;  %1183 = vmatpush3.msra.mxu0 %v378_v16 }
   0xf   :  { %267 = vperm.xlu0 %1345, %v1463_v7   ;;  %1184 = vmatprep.subr.mxu0 %v377_v18 }
  0x10   :  { %1339 = vset.pattern.permute.xlu1 %v1400_v8  ;;  %1185 = vmatpush3.msra.mxu0 %v377_v18 }
  0x11   :  { %261 = vperm.xlu1 %1339, %v1443_v1   ;;  %1186 = vmatprep.subr.mxu0 %v376_v19 }
  0x12   :  { %1187 = vmatpush3.msra.mxu0 %v376_v19 }
  0x13   :  { %276 = vperm.xlu0 %1345, %v1471_v9   ;;  %1188 = vmatprep.subr.mxu0 %v375_v21 }
  0x14   :  { %1189 = vmatpush3.msra.mxu0 %v375_v21 }
  0x15   :  { %264 = vperm.xlu1 %1339, %v19_v0   ;;  %1190 = vmatprep.subr.mxu0 %v374_v22 }
  0x16   :  { %1191 = vmatpush3.msra.mxu0 %v374_v22 }
  0x17   :  { %285 = vperm.xlu0 %1345, %v1478_v10   ;;  %1192 = vmatprep.subr.mxu0 %v373_v23 }
  0x18   :  { %1193 = vmatpush3.msra.mxu0 %v373_v23 }
  0x19   :  { %1340 = vset.pattern.permute.xlu1 %v1397_v2  ;;  %1194 = vmatprep.subr.mxu0 %v372_v24 }
  0x1a   :  { %107 = vperm.xlu1 %1340, %v1463_v7   ;;  %1195 = vmatpush3.msra.mxu0 %v372_v24 }
  0x1b   :  { %294 = vperm.xlu0 %1345, %v1484_v11  }
  0x1e   :  { %1341 = vset.pattern.permute.xlu1 %v1398_v3 }
  0x1f   :  { %46 = vperm.xlu1 %1341, %v21_v4   ;;  %1361 = vset.pattern.permute.xlu0 %v1399_v6 }
  0x20   :  { %184 = vperm.xlu0 %1361, %v19_v0  }
  0x23   :  { %1342 = vset.pattern.permute.xlu1 %v1399_v6 }
  0x24   :  { %187 = vperm.xlu1 %1342, %v1463_v7   ;;  %193 = vperm.xlu0 %1361, %v1455_v5  }
  0x28   :  { %190 = vperm.xlu1 %1342, %v21_v4   ;;  %202 = vperm.xlu0 %1361, %v1503_v14  }
  0x2c   :  { %1343 = vset.pattern.permute.xlu1 %v1400_v8  ;;  %211 = vperm.xlu0 %1361, %v1515_v17  }
  0x2d   :  { %270 = vperm.xlu1 %1343, %v21_v4  }
  0x30   :  { %220 = vperm.xlu0 %1361, %v1528_v20  }
  0x31   :  { %1344 = vset.pattern.permute.xlu1 %v1398_v3 }
  0x32   :  { %49 = vperm.xlu1 %1344, %v1455_v5  }
  0x34   :  { %1365 = vset.pattern.permute.xlu0 %v1398_v3 }
  0x35   :  { %37 = vperm.xlu0 %1365, %v1443_v1  }
  0x36   :  { %52 = vperm.xlu1 %1344, %v1471_v9  }
  0x39   :  { %43 = vperm.xlu0 %1365, %v1463_v7  }
  0x3a   :  { %1346 = vset.pattern.permute.xlu1 %v1397_v2 }
  0x3b   :  { %116 = vperm.xlu1 %1346, %v1471_v9  }
  0x3d   :  { %58 = vperm.xlu0 %1365, %v1503_v14  }
  0x3f   :  { %1347 = vset.pattern.permute.xlu1 %v1399_v6 }
  0x40   :  { %196 = vperm.xlu1 %1347, %v1471_v9  }
  0x41   :  { %61 = vperm.xlu0 %1365, %v1478_v10  }
  0x44   :  { %1348 = vset.pattern.permute.xlu1 %v1400_v8 }
  0x45   :  { %273 = vperm.xlu1 %1348, %v1455_v5   ;;  %76 = vperm.xlu0 %1365, %v1528_v20  }
  0x49   :  { %1349 = vset.pattern.permute.xlu1 %v1398_v3  ;;  %79 = vperm.xlu0 %1365, %v1561_v25  }
  0x4a   :  { %55 = vperm.xlu1 %1349, %v24_v26  }
  0x4d   :  { %1367 = vset.pattern.permute.xlu0 %v1397_v2 }
  0x4e   :  { %1350 = vset.pattern.permute.xlu1 %v1397_v2  ;;  %128 = vperm.xlu0 %1367, %v27_v27  }
  0x4f   :  { %119 = vperm.xlu1 %1350, %v24_v26  }
  0x52   :  { %131 = vperm.xlu0 %1367, %v1515_v17  }
  0x53   :  { %122 = vperm.xlu1 %1350, %v1503_v14  }
  0x56   :  { %146 = vperm.xlu0 %1367, %v1578_v28  }
  0x57   :  { %1351 = vset.pattern.permute.xlu1 %v1399_v6 }
  0x58   :  { %199 = vperm.xlu1 %1351, %v24_v26  }
  0x5a   :  { %1371 = vset.pattern.permute.xlu0 %v1400_v8 }
  0x5b   :  { %303 = vperm.xlu0 %1371, %v1561_v25  }
  0x5c   :  { %1352 = vset.pattern.permute.xlu1 %v1400_v8 }
  0x5d   :  { %279 = vperm.xlu1 %1352, %v24_v26  }
  0x5f   :  { %1374 = vset.pattern.permute.xlu0 %v1398_v3 }
  0x61   :  { %282 = vperm.xlu1 %1352, %v1503_v14  }
  0x65   :  { %1353 = vset.pattern.permute.xlu1 %v1397_v2 }
  0x66   :  { %125 = vperm.xlu1 %1353, %v1478_v10  }
  0x6a   :  { %1354 = vset.pattern.permute.xlu1 %v1398_v3 }
  0x6b   :  { %64 = vperm.xlu1 %1354, %v27_v27  }
  0x6f   :  { %1355 = vset.pattern.permute.xlu1 %v1399_v6 }
  0x70   :  { %205 = vperm.xlu1 %1355, %v1478_v10  }
  0x74   :  { %208 = vperm.xlu1 %1355, %v27_v27  }
  0x78   :  { %1356 = vset.pattern.permute.xlu1 %v1400_v8 }
  0x79   :  { %288 = vperm.xlu1 %1356, %v27_v27  }
  0x7d   :  { %v41_v29 = vpop.permute.xlu1 %40  ;;  %1357 = vset.pattern.permute.xlu1 %v1398_v3  ;;  %v102_v30 = vpop.permute.xlu0 %101 }
  0x7e   :  { %67 = vperm.xlu1 %1357, %v1515_v17   ;;  %vm85_vm2 = vcmp.eq.s32.totalorder %v1623_v50, %v41_v29  ;;  %vm148_vm8 = vcmp.eq.s32.totalorder %v1623_v50, %v102_v30 }
  0x81   :  { %v111_v31 = vpop.permute.xlu0 %110 }
  0x82   :  { %v105_v32 = vpop.permute.xlu1 %104  ;;  %70 = vperm.xlu1 %1357, %v1484_v11   ;;  %vm151_vm3 = vcmp.eq.s32.totalorder %v1623_v50, %v111_v31 }
  0x83   :  { %vm149_vm0 = vcmp.eq.s32.totalorder %v1623_v50, %v105_v32 }
  0x84   :  { %vm165_vm5 = vmor %vm85_vm2, %vm149_vm0 }
  0x85   :  { %v1596_v33 = vpop.permute.xlu0 %113 }
  0x86   :  { %1358 = vset.pattern.permute.xlu1 %v1397_v2 }
  0x87   :  { %134 = vperm.xlu1 %1358, %v1484_v11   ;;  %v182_v34 = vpop.permute.xlu1 %181 }
  0x88   :  { %vm228_vm14 = vcmp.eq.s32.totalorder %v1623_v50, %v182_v34 }
  0x8a   :  { %v1600_v35 = vpop.permute.xlu0 %267 }
  0x8b   :  { %1359 = vset.pattern.permute.xlu1 %v1399_v6 }
  0x8c   :  { %214 = vperm.xlu1 %1359, %v1484_v11   ;;  %v262_v36 = vpop.permute.xlu1 %261 }
  0x8e   :  { %v1604_v37 = vpop.permute.xlu0 %276 }
  0x90   :  { %1360 = vset.pattern.permute.xlu1 %v1400_v8  ;;  %v265_v38 = vpop.permute.xlu1 %264 }
  0x91   :  { %291 = vperm.xlu1 %1360, %v1515_v17   ;;  %vm309_vm9 = vcmp.eq.s32.totalorder %v1623_v50, %v265_v38 }
  0x92   :  { %v1608_v39 = vpop.permute.xlu0 %285 }
  0x95   :  { %1362 = vset.pattern.permute.xlu1 %v1398_v3  ;;  %v108_v41 = vpop.permute.xlu1 %107 }
  0x96   :  { %73 = vperm.xlu1 %1362, %v30_v40   ;;  %v1614_v42 = vpop.permute.xlu0 %294 }
  0x9a   :  { %1363 = vset.pattern.permute.xlu1 %v1397_v2  ;;  %v47_v43 = vpop.permute.xlu1 %46 }
  0x9b   :  { %137 = vperm.xlu1 %1363, %v30_v40   ;;  %v185_v44 = vpop.permute.xlu0 %184  ;;  %vm87_vm4 = vcmp.eq.s32.totalorder %v1623_v50, %v47_v43 }
  0x9c   :  { %vm229_vm1 = vcmp.eq.s32.totalorder %v1623_v50, %v185_v44  ;;  %vm167_vm10 = vmor %vm87_vm4, %vm151_vm3  ;;  %vm382_vm3 = vcmask 654336  }
  0x9d   :  { %vm245_vm6 = vmor %vm165_vm5, %vm229_vm1  ;;  %vm308_vm1 = vcmp.eq.s32.totalorder %v1623_v50, %v262_v36  ;;  %vm310_vm5 = vcmp.eq.s32.totalorder %v1623_v50, %v1600_v35 }
  0x9e   :  { %vm1639_vm11 = vmor %vm245_vm6, %vm309_vm9  ;;  %vm150_vm6 = vcmp.eq.s32.totalorder %v1623_v50, %v108_v41 }
  0x9f   :  { %140 = vperm.xlu1 %1363, %v1528_v20   ;;  %v188_v45 = vpop.permute.xlu1 %187  ;;  %v1618_v46 = vpop.permute.xlu0 %193  ;;  %v1079_v0 = vsel %vm1639_vm11, 1.0, %v1401_v61 }
  0xa0   :  { %vm230_vm9 = vcmp.eq.s32.totalorder %v1623_v50, %v188_v45 }
  0xa3   :  { %1364 = vset.pattern.permute.xlu1 %v1399_v6  ;;  %v191_v48 = vpop.permute.xlu1 %190  ;;  %v1621_v49 = vpop.permute.xlu0 %202 }
  0xa4   :  { %217 = vperm.xlu1 %1364, %v30_v40   ;;  %vm231_vm7 = vcmp.eq.s32.totalorder %v1623_v50, %v191_v48 }
  0xa5   :  { %vm1643_vm12 = vmor %vm167_vm10, %vm231_vm7 }
  0xa7   :  { %v1625_v51 = vpop.permute.xlu0 %211 }
  0xa8   :  { %1366 = vset.pattern.permute.xlu1 %v1400_v8  ;;  %v271_v52 = vpop.permute.xlu1 %270 }
  0xa9   :  { %297 = vperm.xlu1 %1366, %v30_v40   ;;  %vm311_vm15 = vcmp.eq.s32.totalorder %v1623_v50, %v271_v52 }
  0xaa   :  { %vm1658_vm7 = vmor %vm1643_vm12, %vm311_vm15 }
  0xab   :  { %v1631_v53 = vpop.permute.xlu0 %220 }
  0xad   :  { %300 = vperm.xlu1 %1366, %v1528_v20   ;;  %v50_v54 = vpop.permute.xlu1 %49 }
  0xae   :  { %vm88_vm15 = vcmp.eq.s32.totalorder %v1623_v50, %v50_v54  ;;  %v576_v54 = vld [vmem:[%s2074_s2] sm:$0xff] }
  0xb0   :  { %v38_v56 = vpop.permute.xlu0 %37 }
  0xb1   :  { %vm84_vm13 = vcmp.eq.s32.totalorder %v1623_v50, %v38_v56  ;;  %1368 = vset.pattern.permute.xlu1 %v1397_v2  ;;  %v53_v58 = vpop.permute.xlu1 %52  ;;  %v1081_v2 = vsel %vm1658_vm7, 1.0, %v1401_v61 }
  0xb2   :  { %vm164_vm0 = vmor %vm84_vm13, %vm148_vm8  ;;  %143 = vperm.xlu1 %1368, %v1561_v25  }
  0xb3   :  { %vm244_vm2 = vmor %vm164_vm0, %vm228_vm14  ;;  %vm152_vm14 = vcmp.eq.s32.totalorder %v1623_v50, %v1596_v33 }
  0xb4   :  { %v44_v59 = vpop.permute.xlu0 %43  ;;  %vm324_vm4 = vmor %vm244_vm2, %vm308_vm1  ;;  %vm89_vm1 = vcmp.eq.s32.totalorder %v1623_v50, %v53_v58 }
  0xb5   :  { %vm86_vm8 = vcmp.eq.s32.totalorder %v1623_v50, %v44_v59  ;;  %v1078_v62 = vsel %vm324_vm4, 1.0, %v1401_v61  ;;  %vm168_vm11 = vmor %vm88_vm15, %vm152_vm14  ;;  %vm232_vm4 = vcmp.eq.s32.totalorder %v1623_v50, %v1618_v46 }
  0xb6   :  { %vm166_vm10 = vmor %vm86_vm8, %vm150_vm6  ;;  %1369 = vset.pattern.permute.xlu1 %v1398_v3  ;;  %v117_v63 = vpop.permute.xlu1 %116  ;;  %1196 = vmatprep.mubr.msk.f32.mxu0 %vm382_vm3, %v1078_v62  ;;  %vm313_vm6 = vcmp.eq.s32.totalorder %v1623_v50, %v1604_v37 }
  0xb7   :  { %vm246_vm12 = vmor %vm166_vm10, %vm230_vm9  ;;  %82 = vperm.xlu1 %1369, %v1578_v28   ;;  %1197 = vmatmul.mubr.msk.f32.vlgmr.msra.gmra.mxu0 %vm382_vm3, %v1079_v0  ;;  %vm153_vm0 = vcmp.eq.s32.totalorder %v1623_v50, %v117_v63 }
  0xb8   :  { %vm326_vm13 = vmor %vm246_vm12, %vm310_vm5  ;;  %v59_v12 = vpop.permute.xlu0 %58 }
  0xb9   :  { %v1080_v1 = vsel %vm326_vm13, 1.0, %v1401_v61  ;;  %vm169_vm5 = vmor %vm89_vm1, %vm153_vm0  ;;  %vm91_vm15 = vcmp.eq.s32.totalorder %v1623_v50, %v59_v12  ;;  %v585_v12 = vld [vmem:[%s2074_s2 + $0x48] sm:$0xff] }
  0xba   :  { %1199 = vmatprep.mubr.msk.f32.mxu0 %vm382_vm3, %v1080_v1  ;;  %vm248_vm8 = vmor %vm168_vm11, %vm232_vm4 }
  0xbb   :  { %1370 = vset.pattern.permute.xlu1 %v1399_v6  ;;  %v197_v4 = vpop.permute.xlu1 %196  ;;  %1200 = vmatmul.mubr.msk.f32.gmra.mxu0 %vm382_vm3, %v1081_v2 }
  0xbc   :  { %vm233_vm2 = vcmp.eq.s32.totalorder %v1623_v50, %v197_v4  ;;  %223 = vperm.xlu1 %1370, %v1561_v25   ;;  %v62_v14 = vpop.permute.xlu0 %61 }
  0xbd   :  { %vm249_vm7 = vmor %vm169_vm5, %vm233_vm2 }
  0xbe   :  { %vm329_vm9 = vmor %vm249_vm7, %vm313_vm6  ;;  %vm235_vm6 = vcmp.eq.s32.totalorder %v1623_v50, %v1621_v49 }
  0xbf   :  { %v1083_v7 = vsel %vm329_vm9, 1.0, %v1401_v61 }
  0xc0   :  { %226 = vperm.xlu1 %1370, %v1578_v28   ;;  %v274_v5 = vpop.permute.xlu1 %273  ;;  %v77_v18 = vpop.permute.xlu0 %76 }
  0xc1   :  { %vm312_vm10 = vcmp.eq.s32.totalorder %v1623_v50, %v274_v5 }
  0xc2   :  { %vm328_vm12 = vmor %vm248_vm8, %vm312_vm10 }
  0xc3   :  { %v1082_v6 = vsel %vm328_vm12, 1.0, %v1401_v61  ;;  %vm92_vm12 = vcmp.eq.s32.totalorder %v1623_v50, %v62_v14  ;;  %v587_v14 = vld [vmem:[%s2074_s2 + $0x58] sm:$0xff] }
  0xc4   :  { %1372 = vset.pattern.permute.xlu1 %v1400_v8  ;;  %1202 = vmatprep.mubr.msk.f32.mxu0 %vm382_vm3, %v1082_v6  ;;  %v1715_v20 = vpop.permute.xlu0 %79 }
  0xc5   :  { %306 = vperm.xlu1 %1372, %v1578_v28   ;;  %v56_v9 = vpop.permute.xlu1 %55  ;;  %1203 = vmatmul.mubr.msk.f32.gmra.mxu0 %vm382_vm3, %v1083_v7  ;;  %v583_v7 = vld [vmem:[%s2074_s2 + $0x38] sm:$0xff] }
  0xc6   :  { %vm90_vm0 = vcmp.eq.s32.totalorder %v1623_v50, %v56_v9  ;;  %v577_v9 = vld [vmem:[%s2074_s2 + $0x8] sm:$0xff] }
  0xc9   :  { %1373 = vset.pattern.permute.xlu1 %v1398_v3  ;;  %v129_v22 = vpop.permute.xlu0 %128 }
  0xca   :  { %v120_v10 = vpop.permute.xlu1 %119 }
  0xcb   :  { %vm154_vm13 = vcmp.eq.s32.totalorder %v1623_v50, %v120_v10  ;;  %v584_v10 = vld [vmem:[%s2074_s2 + $0x40] sm:$0xff] }
  0xcc   :  { %vm170_vm1 = vmor %vm90_vm0, %vm154_vm13 }
  0xcd   :  { %v132_v29 = vpop.permute.xlu0 %131 }
  0xce   :  { %v123_v11 = vpop.permute.xlu1 %122 }
  0xcf   :  { %vm155_vm14 = vcmp.eq.s32.totalorder %v1623_v50, %v123_v11  ;;  %v578_v11 = vld [vmem:[%s2074_s2 + $0x10] sm:$0xff] }
  0xd0   :  { %vm171_vm2 = vmor %vm91_vm15, %vm155_vm14  ;;  %vm316_vm14 = vcmp.eq.s32.totalorder %v1623_v50, %v1608_v39 }
  0xd1   :  { %vm251_vm8 = vmor %vm171_vm2, %vm235_vm6  ;;  %v147_v44 = vpop.permute.xlu0 %146 }
  0xd3   :  { %v200_v13 = vpop.permute.xlu1 %199 }
  0xd4   :  { %vm234_vm11 = vcmp.eq.s32.totalorder %v1623_v50, %v200_v13  ;;  %v579_v13 = vld [vmem:[%s2074_s2 + $0x18] sm:$0xff] }
  0xd5   :  { %vm250_vm4 = vmor %vm170_vm1, %vm234_vm11 }
  0xd6   :  { %v304_v46 = vpop.permute.xlu0 %303 }
  0xd8   :  { %v280_v8 = vpop.permute.xlu1 %279 }
  0xd9   :  { %vm314_vm5 = vcmp.eq.s32.totalorder %v1623_v50, %v280_v8  ;;  %v586_v8 = vld [vmem:[%s2074_s2 + $0x50] sm:$0xff] }
  0xda   :  { %vm330_vm7 = vmor %vm250_vm4, %vm314_vm5  ;;  %vm157_vm4 = vcmp.eq.s32.totalorder %v1623_v50, %v129_v22  ;;  %v594_v22 = vld [vmem:[%s2074_s2 + $0x90] sm:$0xff] }
  0xdb   :  { %v1084_v3 = vsel %vm330_vm7, 1.0, %v1401_v61 }
  0xdc   :  { %v283_v15 = vpop.permute.xlu1 %282  ;;  %1205 = vmatprep.mubr.msk.f32.mxu0 %vm382_vm3, %v1084_v3  ;;  %v580_v3 = vld [vmem:[%s2074_s2 + $0x20] sm:$0xff] }
  0xdd   :  { %vm315_vm9 = vcmp.eq.s32.totalorder %v1623_v50, %v283_v15  ;;  %v581_v15 = vld [vmem:[%s2074_s2 + $0x28] sm:$0xff] }
  0xde   :  { %vm331_vm10 = vmor %vm251_vm8, %vm315_vm9 }
  0xdf   :  { %v1085_v16 = vsel %vm331_vm10, 1.0, %v1401_v61 }
  0xe0   :  { %1206 = vmatmul.mubr.msk.f32.gmra.mxu0 %vm382_vm3, %v1085_v16  ;;  %v588_v16 = vld [vmem:[%s2074_s2 + $0x60] sm:$0xff] }
  0xe1   :  { %v126_v17 = vpop.permute.xlu1 %125 }
  0xe2   :  { %vm156_vm13 = vcmp.eq.s32.totalorder %v1623_v50, %v126_v17  ;;  %v589_v17 = vld [vmem:[%s2074_s2 + $0x68] sm:$0xff] }
  0xe3   :  { %vm172_vm15 = vmor %vm92_vm12, %vm156_vm13  ;;  %vm158_vm12 = vcmp.eq.s32.totalorder %v1623_v50, %v132_v29 }
  0xe6   :  { %v65_v19 = vpop.permute.xlu1 %64 }
  0xe7   :  { %vm93_vm2 = vcmp.eq.s32.totalorder %v1623_v50, %v65_v19  ;;  %v591_v19 = vld [vmem:[%s2074_s2 + $0x78] sm:$0xff] }
  0xe8   :  { %vm173_vm6 = vmor %vm93_vm2, %vm157_vm4  ;;  %vm319_vm4 = vcmp.eq.s32.totalorder %v1623_v50, %v1614_v42 }
  0xeb   :  { %v206_v21 = vpop.permute.xlu1 %205 }
  0xec   :  { %vm236_vm0 = vcmp.eq.s32.totalorder %v1623_v50, %v206_v21  ;;  %v593_v21 = vld [vmem:[%s2074_s2 + $0x88] sm:$0xff] }
  0xed   :  { %vm252_vm11 = vmor %vm172_vm15, %vm236_vm0 }
  0xee   :  { %vm332_vm1 = vmor %vm252_vm11, %vm316_vm14  ;;  %vm238_vm11 = vcmp.eq.s32.totalorder %v1623_v50, %v1625_v51 }
  0xef   :  { %v209_v23 = vpop.permute.xlu1 %208  ;;  %v1086_v24 = vsel %vm332_vm1, 1.0, %v1401_v61 }
  0xf0   :  { %1208 = vmatprep.mubr.msk.f32.mxu0 %vm382_vm3, %v1086_v24  ;;  %vm237_vm5 = vcmp.eq.s32.totalorder %v1623_v50, %v209_v23  ;;  %v595_v23 = vld [vmem:[%s2074_s2 + $0x98] sm:$0xff]  ;;  %v596_v24 = vld [vmem:[%s2074_s2 + $0xa0] sm:$0xff] }
  0xf1   :  { %vm253_vm7 = vmor %vm173_vm6, %vm237_vm5 }
  0xf4   :  { %v289_v25 = vpop.permute.xlu1 %288 }
  0xf5   :  { %vm317_vm8 = vcmp.eq.s32.totalorder %v1623_v50, %v289_v25  ;;  %v597_v25 = vld [vmem:[%s2074_s2 + $0xa8] sm:$0xff] }
  0xf6   :  { %vm333_vm9 = vmor %vm253_vm7, %vm317_vm8 }
  0xf7   :  { %v1087_v26 = vsel %vm333_vm9, 1.0, %v1401_v61 }
  0xf8   :  { %1209 = vmatmul.mubr.msk.f32.gmra.mxu0 %vm382_vm3, %v1087_v26  ;;  %v598_v26 = vld [vmem:[%s2074_s2 + $0xb0] sm:$0xff] }
  0xf9   :  { %v68_v27 = vpop.permute.xlu1 %67 }
  0xfa   :  { %vm94_vm10 = vcmp.eq.s32.totalorder %v1623_v50, %v68_v27  ;;  %v599_v27 = vld [vmem:[%s2074_s2 + $0xb8] sm:$0xff] }
  0xfb   :  { %vm174_vm14 = vmor %vm94_vm10, %vm158_vm12 }
  0xfc   :  { %vm254_vm5 = vmor %vm174_vm14, %vm238_vm11  ;;  %vm97_vm14 = vcmp.eq.s32.totalorder %v1623_v50, %v77_v18  ;;  %v590_v18 = vld [vmem:[%s2074_s2 + $0x70] sm:$0xff] }
  0xfd   :  { %v71_v28 = vpop.permute.xlu1 %70 }
  0xfe   :  { %vm95_vm15 = vcmp.eq.s32.totalorder %v1623_v50, %v71_v28 }
 0x102   :  { %v135_v30 = vpop.permute.xlu1 %134 }
 0x103   :  { %vm159_vm13 = vcmp.eq.s32.totalorder %v1623_v50, %v135_v30 }
 0x104   :  { %vm175_vm1 = vmor %vm95_vm15, %vm159_vm13 }
 0x107   :  { %v215_v31 = vpop.permute.xlu1 %214 }
 0x108   :  { %vm239_vm0 = vcmp.eq.s32.totalorder %v1623_v50, %v215_v31 }
 0x109   :  { %vm255_vm2 = vmor %vm175_vm1, %vm239_vm0 }
 0x10a   :  { %vm335_vm6 = vmor %vm255_vm2, %vm319_vm4  ;;  %vm241_vm4 = vcmp.eq.s32.totalorder %v1623_v50, %v1631_v53  ;;  %v582_v53 = vld [vmem:[%s2074_s2 + $0x30] sm:$0xff] }
 0x10b   :  { %v1089_v34 = vsel %vm335_vm6, 1.0, %v1401_v61  ;;  %1261 = vmatprep.mubr.f32.mxu1 %v582_v53  ;;  %v962_v53 = vld [vmem:[%s2075_s3] sm:$0xff] }
 0x10c   :  { %v292_v32 = vpop.permute.xlu1 %291 }
 0x10d   :  { %vm318_vm7 = vcmp.eq.s32.totalorder %v1623_v50, %v292_v32 }
 0x10e   :  { %vm334_vm8 = vmor %vm254_vm5, %vm318_vm7 }
 0x10f   :  { %v1088_v33 = vsel %vm334_vm8, 1.0, %v1401_v61 }
 0x110   :  { %1211 = vmatprep.mubr.msk.f32.mxu0 %vm382_vm3, %v1088_v33 }
 0x111   :  { %v74_v35 = vpop.permute.xlu1 %73  ;;  %1212 = vmatmul.mubr.msk.f32.gmra.mxu0 %vm382_vm3, %v1089_v34 }
 0x112   :  { %vm96_vm12 = vcmp.eq.s32.totalorder %v1623_v50, %v74_v35 }
 0x116   :  { %v138_v36 = vpop.permute.xlu1 %137 }
 0x117   :  { %vm160_vm9 = vcmp.eq.s32.totalorder %v1623_v50, %v138_v36 }
 0x118   :  { %vm176_vm15 = vmor %vm96_vm12, %vm160_vm9  ;;  %vm98_vm9 = vcmp.eq.s32.totalorder %v1623_v50, %v1715_v20  ;;  %v592_v20 = vld [vmem:[%s2074_s2 + $0x80] sm:$0xff]  ;;  %s1402_s2 = smov 32  }
 0x11a   :  { %v141_v37 = vpop.permute.xlu1 %140 }
 0x11b   :  { %vm161_vm10 = vcmp.eq.s32.totalorder %v1623_v50, %v141_v37 }
 0x11c   :  { %vm177_vm0 = vmor %vm97_vm14, %vm161_vm10  ;;  %vm322_vm10 = vcmp.eq.s32.totalorder %v1623_v50, %v304_v46 }
 0x11d   :  { %vm257_vm5 = vmor %vm177_vm0, %vm241_vm4  ;;  %vm163_vm0 = vcmp.eq.s32.totalorder %v1623_v50, %v147_v44 }
 0x11f   :  { %v218_v38 = vpop.permute.xlu1 %217 }
 0x120   :  { %vm240_vm13 = vcmp.eq.s32.totalorder %v1623_v50, %v218_v38 }
 0x121   :  { %vm256_vm11 = vmor %vm176_vm15, %vm240_vm13 }
 0x124   :  { %v298_v39 = vpop.permute.xlu1 %297 }
 0x125   :  { %vm320_vm1 = vcmp.eq.s32.totalorder %v1623_v50, %v298_v39 }
 0x126   :  { %vm336_vm2 = vmor %vm256_vm11, %vm320_vm1 }
 0x127   :  { %v1090_v40 = vsel %vm336_vm2, 1.0, %v1401_v61 }
 0x128   :  { %v301_v41 = vpop.permute.xlu1 %300  ;;  %1214 = vmatprep.mubr.msk.f32.mxu0 %vm382_vm3, %v1090_v40 }
 0x129   :  { %vm321_vm6 = vcmp.eq.s32.totalorder %v1623_v50, %v301_v41 }
 0x12a   :  { %vm337_vm7 = vmor %vm257_vm5, %vm321_vm6 }
 0x12b   :  { %v1091_v42 = vsel %vm337_vm7, 1.0, %v1401_v61  ;;  %vm1026_vm7 = vcmask 261120  }
 0x12c   :  { %1215 = vmatmul.mubr.msk.f32.gmra.mxu0 %vm382_vm3, %v1091_v42 }
 0x12d   :  { %v144_v43 = vpop.permute.xlu1 %143 }
 0x12e   :  { %vm162_vm8 = vcmp.eq.s32.totalorder %v1623_v50, %v144_v43 }
 0x12f   :  { %vm178_vm12 = vmor %vm98_vm9, %vm162_vm8  ;;  %vm1037_vm8 = vcmask 523520   ;;  %vm1048_vm9 = vcmask 785920  }
 0x132   :  { %v83_v45 = vpop.permute.xlu1 %82 }
 0x133   :  { %vm99_vm11 = vcmp.eq.s32.totalorder %v1623_v50, %v83_v45 }
 0x134   :  { %vm179_vm2 = vmor %vm99_vm11, %vm163_vm0 }
 0x137   :  { %v224_v47 = vpop.permute.xlu1 %223 }
 0x138   :  { %vm242_vm13 = vcmp.eq.s32.totalorder %v1623_v50, %v224_v47 }
 0x139   :  { %vm258_vm14 = vmor %vm178_vm12, %vm242_vm13 }
 0x13a   :  { %vm338_vm15 = vmor %vm258_vm14, %vm322_vm10  ;;  %vm1059_vm10 = vcmask 1048320  }
 0x13b   :  { %v1092_v48 = vsel %vm338_vm15, 1.0, %v1401_v61  ;;  %v227_v49 = vpop.permute.xlu1 %226 }
 0x13c   :  { %1217 = vmatprep.mubr.msk.f32.mxu0 %vm382_vm3, %v1092_v48  ;;  %vm243_vm1 = vcmp.eq.s32.totalorder %v1623_v50, %v227_v49 }
 0x13d   :  { %vm259_vm4 = vmor %vm179_vm2, %vm243_vm1 }
 0x140   :  { %v307_v51 = vpop.permute.xlu1 %306 }
 0x141   :  { %vm323_vm5 = vcmp.eq.s32.totalorder %v1623_v50, %v307_v51 }
 0x142   :  { %vm339_vm6 = vmor %vm259_vm4, %vm323_vm5 }
 0x143   :  { %v1093_v52 = vsel %vm339_vm6, 1.0, %v1401_v61 }
 0x144   :  { %1218 = vmatmul.mubr.msk.f32.gmra.mxu0 %vm382_vm3, %v1093_v52  ;;  %vm785_vm3 = vcmask 1047808  }
 0x145   :  { %1252 = vmatprep.mubr.f32.mxu0 %v576_v54 }
 0x177   :  { %v1776_v55 = vpop.f32.mrf.mxu0 }
 0x179   :  { %v1778_v56 = vpop.f32.mrf.mxu0 }
 0x17b   :  { %v1780_v50 = vpop.f32.mrf.mxu0 }
 0x17d   :  { %v1782_v57 = vpop.f32.mrf.mxu0 }
 0x185   :  { %v1204_v58 = vpop.f32.mrf.mxu0 }
 0x187   :  { %v517_v59 = vpop.f32.mrf.mxu0 }
 0x1a0   :  { %v1207_v60 = vpop.f32.mrf.mxu0 }
 0x1a2   :  { %v527_v61 = vpop.f32.mrf.mxu0 }
 0x1b8   :  { %v1210_v62 = vpop.f32.mrf.mxu0 }
 0x1ba   :  { %v537_v63 = vpop.f32.mrf.mxu0 }
 0x1d1   :  { %v1213_v0 = vpop.f32.mrf.mxu0 }
 0x1d3   :  { %v547_v1 = vpop.f32.mrf.mxu0 }
 0x1ec   :  { %v1216_v2 = vpop.f32.mrf.mxu0 }
 0x1ee   :  { %v557_v4 = vpop.f32.mrf.mxu0 }
 0x204   :  { %v1219_v5 = vpop.f32.mrf.mxu0 }
 0x205   :  { %1220 = vmatprep.subr.mxu0 %v1219_v5  ;;  %1288 = vmatprep.subr.mxu1 %v1219_v5 }
 0x206   :  { %v567_v6 = vpop.f32.mrf.mxu0  ;;  %1221 = vmatpush3.msra.mxu0 %v1219_v5  ;;  %1304 = vmatpush3.msra.mxu1 %v1219_v5 }
 0x207   :  { %1222 = vmatprep.subr.mxu0 %v567_v6  ;;  %1289 = vmatprep.subr.mxu1 %v567_v6 }
 0x208   :  { %1223 = vmatpush3.msra.mxu0 %v567_v6  ;;  %1305 = vmatpush3.msra.mxu1 %v567_v6 }
 0x209   :  { %1224 = vmatprep.subr.mxu0 %v1216_v2  ;;  %1290 = vmatprep.subr.mxu1 %v1216_v2 }
 0x20a   :  { %1225 = vmatpush3.msra.mxu0 %v1216_v2  ;;  %1306 = vmatpush3.msra.mxu1 %v1216_v2 }
 0x20b   :  { %1226 = vmatprep.subr.mxu0 %v557_v4  ;;  %1291 = vmatprep.subr.mxu1 %v557_v4 }
 0x20c   :  { %1227 = vmatpush3.msra.mxu0 %v557_v4  ;;  %1307 = vmatpush3.msra.mxu1 %v557_v4 }
 0x20d   :  { %1228 = vmatprep.subr.mxu0 %v1213_v0  ;;  %1292 = vmatprep.subr.mxu1 %v1213_v0 }
 0x20e   :  { %1229 = vmatpush3.msra.mxu0 %v1213_v0  ;;  %1308 = vmatpush3.msra.mxu1 %v1213_v0 }
 0x20f   :  { %1230 = vmatprep.subr.mxu0 %v547_v1  ;;  %1293 = vmatprep.subr.mxu1 %v547_v1 }
 0x210   :  { %1231 = vmatpush3.msra.mxu0 %v547_v1  ;;  %1309 = vmatpush3.msra.mxu1 %v547_v1 }
 0x211   :  { %1232 = vmatprep.subr.mxu0 %v1210_v62  ;;  %1294 = vmatprep.subr.mxu1 %v1210_v62 }
 0x212   :  { %1233 = vmatpush3.msra.mxu0 %v1210_v62  ;;  %1310 = vmatpush3.msra.mxu1 %v1210_v62 }
 0x213   :  { %1234 = vmatprep.subr.mxu0 %v537_v63  ;;  %1295 = vmatprep.subr.mxu1 %v537_v63 }
 0x214   :  { %1235 = vmatpush3.msra.mxu0 %v537_v63  ;;  %1311 = vmatpush3.msra.mxu1 %v537_v63 }
 0x215   :  { %1236 = vmatprep.subr.mxu0 %v1207_v60  ;;  %1296 = vmatprep.subr.mxu1 %v1207_v60 }
 0x216   :  { %1237 = vmatpush3.msra.mxu0 %v1207_v60  ;;  %1312 = vmatpush3.msra.mxu1 %v1207_v60 }
 0x217   :  { %1238 = vmatprep.subr.mxu0 %v527_v61  ;;  %1297 = vmatprep.subr.mxu1 %v527_v61 }
 0x218   :  { %1239 = vmatpush3.msra.mxu0 %v527_v61  ;;  %1313 = vmatpush3.msra.mxu1 %v527_v61 }
 0x219   :  { %1240 = vmatprep.subr.mxu0 %v1204_v58  ;;  %1298 = vmatprep.subr.mxu1 %v1204_v58 }
 0x21a   :  { %1241 = vmatpush3.msra.mxu0 %v1204_v58  ;;  %1314 = vmatpush3.msra.mxu1 %v1204_v58 }
 0x21b   :  { %1242 = vmatprep.subr.mxu0 %v517_v59  ;;  %1299 = vmatprep.subr.mxu1 %v517_v59 }
 0x21c   :  { %1243 = vmatpush3.msra.mxu0 %v517_v59  ;;  %1315 = vmatpush3.msra.mxu1 %v517_v59 }
 0x21d   :  { %1244 = vmatprep.subr.mxu0 %v1780_v50  ;;  %1300 = vmatprep.subr.mxu1 %v1780_v50 }
 0x21e   :  { %1245 = vmatpush3.msra.mxu0 %v1780_v50  ;;  %1316 = vmatpush3.msra.mxu1 %v1780_v50 }
 0x21f   :  { %1246 = vmatprep.subr.mxu0 %v1782_v57  ;;  %1301 = vmatprep.subr.mxu1 %v1782_v57 }
 0x220   :  { %1247 = vmatpush3.msra.mxu0 %v1782_v57  ;;  %1317 = vmatpush3.msra.mxu1 %v1782_v57 }
 0x221   :  { %1248 = vmatprep.subr.mxu0 %v1776_v55  ;;  %1302 = vmatprep.subr.mxu1 %v1776_v55 }
 0x222   :  { %1249 = vmatpush3.msra.mxu0 %v1776_v55  ;;  %1318 = vmatpush3.msra.mxu1 %v1776_v55 }
 0x223   :  { %1250 = vmatprep.subr.mxu0 %v1778_v56  ;;  %1303 = vmatprep.subr.mxu1 %v1778_v56 }
 0x224   :  { %1251 = vmatpush3.msra.mxu0 %v1778_v56  ;;  %1319 = vmatpush3.msra.mxu1 %v1778_v56 }
 0x225   :  { %1262 = vmatmul.mubr.f32.vlgmr.msra.gmra.mxu1 %v583_v7  ;;  %1253 = vmatmul.mubr.f32.vlgmr.msra.gmra.mxu0 %v577_v9 }
 0x226   :  { %1264 = vmatprep.mubr.f32.mxu1 %v584_v10  ;;  %1255 = vmatprep.mubr.f32.mxu0 %v578_v11  ;;  %v963_v11 = vld [vmem:[%s2075_s3 + $0x8] sm:$0xff] }
 0x229   :  { %1265 = vmatmul.mubr.f32.gmra.mxu1 %v585_v12  ;;  %1256 = vmatmul.mubr.f32.gmra.mxu0 %v579_v13 }
 0x22a   :  { %1267 = vmatprep.mubr.f32.mxu1 %v586_v8  ;;  %1258 = vmatprep.mubr.f32.mxu0 %v580_v3 }
 0x22d   :  { %1268 = vmatmul.mubr.f32.gmra.mxu1 %v587_v14  ;;  %1259 = vmatmul.mubr.f32.gmra.mxu0 %v581_v15  ;;  %v964_v14 = vld [vmem:[%s2075_s3 + $0x10] sm:$0xff] }
 0x22e   :  { %1270 = vmatprep.mubr.f32.mxu1 %v588_v16 }
 0x231   :  { %1271 = vmatmul.mubr.f32.gmra.mxu1 %v589_v17  ;;  %v965_v17 = vld [vmem:[%s2075_s3 + $0x18] sm:$0xff] }
 0x232   :  { %1273 = vmatprep.mubr.f32.mxu1 %v590_v18 }
 0x235   :  { %1274 = vmatmul.mubr.f32.gmra.mxu1 %v591_v19 }
 0x236   :  { %1276 = vmatprep.mubr.f32.mxu1 %v592_v20  ;;  %v966_v20 = vld [vmem:[%s2075_s3 + $0x20] sm:$0xff] }
 0x239   :  { %1277 = vmatmul.mubr.f32.gmra.mxu1 %v593_v21 }
 0x23a   :  { %1279 = vmatprep.mubr.f32.mxu1 %v594_v22 }
 0x23d   :  { %1280 = vmatmul.mubr.f32.gmra.mxu1 %v595_v23  ;;  %v967_v23 = vld [vmem:[%s2075_s3 + $0x28] sm:$0xff] }
 0x23e   :  { %1282 = vmatprep.mubr.f32.mxu1 %v596_v24 }
 0x241   :  { %1283 = vmatmul.mubr.f32.gmra.mxu1 %v597_v25 }
 0x242   :  { %1285 = vmatprep.mubr.f32.mxu1 %v598_v26  ;;  %v968_v26 = vld [vmem:[%s2075_s3 + $0x30] sm:$0xff] }
 0x245   :  { %1286 = vmatmul.mubr.f32.gmra.mxu1 %v599_v27  ;;  %v969_v27 = vld [vmem:[%s2075_s3 + $0x38] sm:$0xff]  ;;  %s1405_s3 = smov 97  }
 0x2e5   :  { %v1866_v28 = vpop.f32.mrf.mxu1  ;;  %v1900_v42 = vpop.f32.mrf.mxu0 }
 0x2e7   :  { %v1868_v29 = vpop.f32.mrf.mxu1  ;;  %v1910_v45 = vpop.f32.mrf.mxu0 }
 0x2e9   :  { %v1870_v30 = vpop.f32.mrf.mxu1  ;;  %v1916_v47 = vpop.f32.mrf.mxu0 }
 0x2eb   :  { %v1872_v31 = vpop.f32.mrf.mxu1  ;;  %v1924_v49 = vpop.f32.mrf.mxu0 }
 0x2ed   :  { %v1874_v32 = vpop.f32.mrf.mxu1  ;;  %v1930_v51 = vpop.f32.mrf.mxu0 }
 0x2ef   :  { %v1876_v33 = vpop.f32.mrf.mxu1  ;;  %v1936_v52 = vpop.f32.mrf.mxu0 }
 0x2f1   :  { %v1878_v34 = vpop.f32.mrf.mxu1 }
 0x2f3   :  { %v1880_v35 = vpop.f32.mrf.mxu1 }
 0x2f5   :  { %v1882_v36 = vpop.f32.mrf.mxu1 }
 0x2f7   :  { %v1884_v37 = vpop.f32.mrf.mxu1 }
 0x2f9   :  { %v1886_v38 = vpop.f32.mrf.mxu1 }
 0x2fa   :  { %877 = vrot.lane.b32.xlu0 %v1886_v38, %s1402_s2 }
 0x2fb   :  { %v1890_v39 = vpop.f32.mrf.mxu1 }
 0x2fc   :  { %874 = vrot.lane.b32.xlu1 %v1890_v39, %s1402_s2 }
 0x2fd   :  { %v1894_v40 = vpop.f32.mrf.mxu1 }
 0x2fe   :  { %883 = vrot.lane.b32.xlu0 %v1894_v40, %s1402_s2 }
 0x2ff   :  { %v1898_v41 = vpop.f32.mrf.mxu1 }
 0x300   :  { %880 = vrot.lane.b32.xlu1 %v1898_v41, %s1402_s2 }
 0x301   :  { %v1904_v43 = vpop.f32.mrf.mxu1 }
 0x302   :  { %889 = vrot.lane.b32.xlu0 %v1904_v43, %s1402_s2 }
 0x303   :  { %v1908_v44 = vpop.f32.mrf.mxu1 }
 0x304   :  { %886 = vrot.lane.b32.xlu1 %v1908_v44, %s1402_s2 }
 0x305   :  { %v1914_v46 = vpop.f32.mrf.mxu1 }
 0x306   :  { %895 = vrot.lane.b32.xlu0 %v1914_v46, %s1402_s2 }
 0x307   :  { %v1920_v48 = vpop.f32.mrf.mxu1 }
 0x308   :  { %892 = vrot.lane.b32.xlu1 %v1920_v48, %s1402_s2 }
 0x30a   :  { %789 = vrot.lane.b32.xlu0 %v1900_v42, %s1402_s2 }
 0x30c   :  { %786 = vrot.lane.b32.xlu1 %v1910_v45, %s1402_s2 }
 0x30e   :  { %795 = vrot.lane.b32.xlu0 %v1916_v47, %s1402_s2 }
 0x310   :  { %792 = vrot.lane.b32.xlu1 %v1924_v49, %s1402_s2 }
 0x312   :  { %801 = vrot.lane.b32.xlu0 %v1930_v51, %s1402_s2 }
 0x314   :  { %798 = vrot.lane.b32.xlu1 %v1936_v52, %s1402_s2 }
 0x316   :  { %807 = vrot.lane.b32.xlu0 %v1866_v28, %s1402_s2 }
 0x318   :  { %804 = vrot.lane.b32.xlu1 %v1868_v29, %s1402_s2 }
 0x31c   :  { %972 = vperm.xlu1 %1373, %v962_v53  }
 0x36c   :  { %v878_v54 = vpop.permute.xlu0 %877 }
 0x36d   :  { %v879_v1 = vsel %vm785_vm3, %v878_v54, %v1886_v38 }
 0x36e   :  { %v875_v55 = vpop.permute.xlu1 %874 }
 0x36f   :  { %v876_v2 = vsel %vm785_vm3, %v875_v55, %v1890_v39 }
 0x370   :  { %v884_v56 = vpop.permute.xlu0 %883 }
 0x371   :  { %v885_v4 = vsel %vm785_vm3, %v884_v56, %v1894_v40 }
 0x372   :  { %v881_v50 = vpop.permute.xlu1 %880 }
 0x373   :  { %v882_v5 = vsel %vm785_vm3, %v881_v50, %v1898_v41 }
 0x374   :  { %v890_v57 = vpop.permute.xlu0 %889 }
 0x375   :  { %v891_v6 = vsel %vm785_vm3, %v890_v57, %v1904_v43 }
 0x376   :  { %v887_v58 = vpop.permute.xlu1 %886 }
 0x377   :  { %v888_v7 = vsel %vm785_vm3, %v887_v58, %v1908_v44 }
 0x378   :  { %v896_v59 = vpop.permute.xlu0 %895 }
 0x379   :  { %v897_v9 = vsel %vm785_vm3, %v896_v59, %v1914_v46 }
 0x37a   :  { %v893_v60 = vpop.permute.xlu1 %892 }
 0x37b   :  { %v894_v10 = vsel %vm785_vm3, %v893_v60, %v1920_v48 }
 0x37c   :  { %v790_v61 = vpop.permute.xlu0 %789 }
 0x37d   :  { %v791_v62 = vsel %vm785_vm3, %v790_v61, %v1900_v42 }
 0x37e   :  { %v787_v63 = vpop.permute.xlu1 %786  ;;  %812 = vrot.lane.b32.xlu0 %v791_v62, %s1402_s2 }
 0x37f   :  { %v788_v0 = vsel %vm785_vm3, %v787_v63, %v1910_v45 }
 0x380   :  { %810 = vrot.lane.b32.xlu1 %v788_v0, %s1402_s2  ;;  %v796_v8 = vpop.permute.xlu0 %795 }
 0x381   :  { %v797_v3 = vsel %vm785_vm3, %v796_v8, %v1916_v47 }
 0x382   :  { %900 = vrot.lane.b32.xlu0 %v879_v1, %s1402_s2  ;;  %v793_v12 = vpop.permute.xlu1 %792 }
 0x383   :  { %v794_v13 = vsel %vm785_vm3, %v793_v12, %v1924_v49 }
 0x384   :  { %898 = vrot.lane.b32.xlu1 %v876_v2, %s1402_s2  ;;  %v802_v18 = vpop.permute.xlu0 %801 }
 0x385   :  { %v803_v19 = vsel %vm785_vm3, %v802_v18, %v1930_v51 }
 0x386   :  { %904 = vrot.lane.b32.xlu0 %v885_v4, %s1402_s2  ;;  %v799_v15 = vpop.permute.xlu1 %798 }
 0x387   :  { %v800_v16 = vsel %vm785_vm3, %v799_v15, %v1936_v52 }
 0x388   :  { %902 = vrot.lane.b32.xlu1 %v882_v5, %s1402_s2  ;;  %v808_v24 = vpop.permute.xlu0 %807 }
 0x389   :  { %v809_v25 = vsel %vm785_vm3, %v808_v24, %v1866_v28 }
 0x38a   :  { %908 = vrot.lane.b32.xlu0 %v891_v6, %s1402_s2  ;;  %v805_v21 = vpop.permute.xlu1 %804 }
 0x38b   :  { %v806_v22 = vsel %vm785_vm3, %v805_v21, %v1868_v29 }
 0x38c   :  { %906 = vrot.lane.b32.xlu1 %v888_v7, %s1402_s2 }
 0x38e   :  { %912 = vrot.lane.b32.xlu0 %v897_v9, %s1402_s2 }
 0x390   :  { %910 = vrot.lane.b32.xlu1 %v894_v10, %s1402_s2 }
 0x392   :  { %977 = vperm.xlu0 %1374, %v963_v11  }
 0x394   :  { %814 = vrot.lane.b32.xlu1 %v794_v13, %s1402_s2 }
 0x396   :  { %842 = vrot.lane.b32.xlu0 %v1872_v31, %s1403_s10 }
 0x398   :  { %816 = vrot.lane.b32.xlu1 %v797_v3, %s1402_s2 }
 0x39a   :  { %982 = vperm.xlu0 %1374, %v964_v14  }
 0x39c   :  { %844 = vrot.lane.b32.xlu1 %v1870_v30, %s1403_s10  ;;  %v2034_v30 = vpop.permute.xlu1 %972 }
 0x39e   :  { %818 = vrot.lane.b32.xlu0 %v800_v16, %s1402_s2 }
 0x3a0   :  { %987 = vperm.xlu1 %1373, %v965_v17  }
 0x3a2   :  { %846 = vrot.lane.b32.xlu0 %v1876_v33, %s1403_s10 }
 0x3a4   :  { %820 = vrot.lane.b32.xlu1 %v803_v19, %s1402_s2 }
 0x3a6   :  { %992 = vperm.xlu0 %1374, %v966_v20  }
 0x3a8   :  { %848 = vrot.lane.b32.xlu1 %v1874_v32, %s1403_s10 }
 0x3aa   :  { %822 = vrot.lane.b32.xlu0 %v806_v22, %s1402_s2 }
 0x3ac   :  { %997 = vperm.xlu1 %1373, %v967_v23  }
 0x3ae   :  { %850 = vrot.lane.b32.xlu0 %v1880_v35, %s1403_s10 }
 0x3b0   :  { %824 = vrot.lane.b32.xlu1 %v809_v25, %s1402_s2 }
 0x3b2   :  { %1002 = vperm.xlu0 %1374, %v968_v26  }
 0x3b4   :  { %852 = vrot.lane.b32.xlu1 %v1878_v34, %s1403_s10 }
 0x3b6   :  { %854 = vrot.lane.b32.xlu0 %v1884_v37, %s1403_s10 }
 0x3b8   :  { %1007 = vperm.xlu1 %1373, %v969_v27  }
 0x3bc   :  { %856 = vrot.lane.b32.xlu1 %v1882_v36, %s1403_s10 }
 0x3f0   :  { %v813_v31 = vpop.permute.xlu0 %812 }
 0x3f1   :  { %v827_v13 = vsel %vm785_vm3, %v813_v31, %v1900_v42 }
 0x3f2   :  { %v811_v32 = vpop.permute.xlu1 %810 }
 0x3f3   :  { %v826_v14 = vsel %vm785_vm3, %v811_v32, %v1910_v45 }
 0x3f4   :  { %v901_v33 = vpop.permute.xlu0 %900 }
 0x3f5   :  { %v915_v35 = vsel %vm785_vm3, %v901_v33, %v1886_v38 }
 0x3f6   :  { %932 = vrot.lane.b32.xlu1 %v915_v35, %s1404_s22  ;;  %v899_v34 = vpop.permute.xlu1 %898 }
 0x3f7   :  { %v914_v53 = vsel %vm785_vm3, %v899_v34, %v1890_v39 }
 0x3f8   :  { %v905_v54 = vpop.permute.xlu0 %904  ;;  %930 = vrot.lane.b32.xlu0 %v914_v53, %s1404_s22 }
 0x3f9   :  { %v917_v37 = vsel %vm785_vm3, %v905_v54, %v1894_v40 }
 0x3fa   :  { %936 = vrot.lane.b32.xlu1 %v917_v37, %s1404_s22  ;;  %v903_v36 = vpop.permute.xlu1 %902 }
 0x3fb   :  { %v916_v55 = vsel %vm785_vm3, %v903_v36, %v1898_v41 }
 0x3fc   :  { %v909_v56 = vpop.permute.xlu0 %908  ;;  %934 = vrot.lane.b32.xlu0 %v916_v55, %s1404_s22 }
 0x3fd   :  { %v919_v38 = vsel %vm785_vm3, %v909_v56, %v1904_v43 }
 0x3fe   :  { %940 = vrot.lane.b32.xlu1 %v919_v38, %s1404_s22  ;;  %v907_v50 = vpop.permute.xlu1 %906 }
 0x3ff   :  { %v918_v39 = vsel %vm785_vm3, %v907_v50, %v1908_v44 }
 0x400   :  { %v913_v57 = vpop.permute.xlu0 %912  ;;  %938 = vrot.lane.b32.xlu0 %v918_v39, %s1404_s22 }
 0x401   :  { %v921_v40 = vsel %vm785_vm3, %v913_v57, %v1914_v46 }
 0x402   :  { %944 = vrot.lane.b32.xlu1 %v921_v40, %s1404_s22  ;;  %v911_v58 = vpop.permute.xlu1 %910 }
 0x403   :  { %v920_v41 = vsel %vm785_vm3, %v911_v58, %v1920_v48 }
 0x404   :  { %942 = vrot.lane.b32.xlu0 %v920_v41, %s1404_s22 }
 0x406   :  { %v815_v59 = vpop.permute.xlu1 %814 }
 0x407   :  { %v828_v23 = vsel %vm785_vm3, %v815_v59, %v1924_v49 }
 0x40a   :  { %v817_v60 = vpop.permute.xlu1 %816 }
 0x40b   :  { %v829_v18 = vsel %vm785_vm3, %v817_v60, %v1916_v47 }
 0x40d   :  { %v978_v61 = vpop.permute.xlu0 %977 }
 0x40e   :  { %v845_v43 = vpop.permute.xlu1 %844 }
 0x40f   :  { %v867_v3 = vadd.f32 %v845_v43, %v827_v13 }
 0x411   :  { %v843_v62 = vpop.permute.xlu0 %842 }
 0x412   :  { %v866_v16 = vadd.f32 %v843_v62, %v826_v14 }
 0x415   :  { %v983_v0 = vpop.permute.xlu0 %982 }
 0x419   :  { %v819_v44 = vpop.permute.xlu0 %818 }
 0x41a   :  { %v830_v33 = vsel %vm785_vm3, %v819_v44, %v1936_v52 }
 0x41b   :  { %v988_v63 = vpop.permute.xlu1 %987 }
 0x41d   :  { %v847_v4 = vpop.permute.xlu0 %846 }
 0x41e   :  { %v868_v42 = vadd.f32 %v847_v4, %v828_v23 }
 0x41f   :  { %v821_v1 = vpop.permute.xlu1 %820 }
 0x420   :  { %v831_v45 = vsel %vm785_vm3, %v821_v1, %v1930_v51 }
 0x421   :  { %v993_v6 = vpop.permute.xlu0 %992 }
 0x423   :  { %v849_v2 = vpop.permute.xlu1 %848 }
 0x424   :  { %v869_v20 = vadd.f32 %v849_v2, %v829_v18 }
 0x425   :  { %v823_v7 = vpop.permute.xlu0 %822 }
 0x426   :  { %v832_v55 = vsel %vm785_vm3, %v823_v7, %v1868_v29 }
 0x427   :  { %v998_v5 = vpop.permute.xlu1 %997 }
 0x429   :  { %v851_v10 = vpop.permute.xlu0 %850 }
 0x42a   :  { %v870_v49 = vadd.f32 %v851_v10, %v830_v33 }
 0x42b   :  { %v825_v46 = vpop.permute.xlu1 %824 }
 0x42d   :  { %v1003_v48 = vpop.permute.xlu0 %1002 }
 0x42f   :  { %v853_v9 = vpop.permute.xlu1 %852 }
 0x430   :  { %v871_v31 = vadd.f32 %v853_v9, %v831_v45 }
 0x431   :  { %v855_v8 = vpop.permute.xlu0 %854 }
 0x432   :  { %v872_v38 = vadd.f32 %v855_v8, %v832_v55 }
 0x433   :  { %v1008_v11 = vpop.permute.xlu1 %1007 }
 0x437   :  { %v857_v12 = vpop.permute.xlu1 %856 }
 0x468   :  { %v933_v15 = vpop.permute.xlu1 %932 }
 0x469   :  { %v955_v17 = vadd.f32 %v933_v15, %v867_v3 }
 0x46a   :  { %v931_v19 = vpop.permute.xlu0 %930 }
 0x46b   :  { %v1011_v21 = vadd.f32 %v978_v61, %v955_v17  ;;  %v954_v22 = vadd.f32 %v931_v19, %v866_v16 }
 0x46c   :  { %v937_v24 = vpop.permute.xlu1 %936 }
 0x46d   :  { %v1010_v25 = vadd.f32 %v2034_v30, %v954_v22  ;;  %v957_v26 = vadd.f32 %v937_v24, %v869_v20  ;;  %1022 = vrot.lane.b32.xlu1 %v1011_v21, %s1405_s3  ;;  %v833_v30 = vsel %vm785_vm3, %v825_v46, %v1866_v28 }
 0x46e   :  { %v935_v27 = vpop.permute.xlu0 %934  ;;  %v873_v37 = vadd.f32 %v857_v12, %v833_v30 }
 0x46f   :  { %v1013_v47 = vadd.f32 %v988_v63, %v957_v26  ;;  %v956_v32 = vadd.f32 %v935_v27, %v868_v42  ;;  %1020 = vrot.lane.b32.xlu0 %v1010_v25, %s1405_s3 }
 0x470   :  { %v941_v35 = vpop.permute.xlu1 %940 }
 0x471   :  { %v1012_v34 = vadd.f32 %v983_v0, %v956_v32  ;;  %v959_v53 = vadd.f32 %v941_v35, %v871_v31  ;;  %1033 = vrot.lane.b32.xlu1 %v1013_v47, %s1406_s23 }
 0x472   :  { %v939_v54 = vpop.permute.xlu0 %938 }
 0x473   :  { %v1015_v51 = vadd.f32 %v998_v5, %v959_v53  ;;  %v958_v36 = vadd.f32 %v939_v54, %v870_v49  ;;  %1031 = vrot.lane.b32.xlu0 %v1012_v34, %s1406_s23 }
 0x474   :  { %v945_v56 = vpop.permute.xlu1 %944 }
 0x475   :  { %v1014_v52 = vadd.f32 %v993_v6, %v958_v36  ;;  %v961_v50 = vadd.f32 %v945_v56, %v873_v37  ;;  %1044 = vrot.lane.b32.xlu1 %v1015_v51, %s1407_s24 }
 0x476   :  { %v943_v39 = vpop.permute.xlu0 %942 }
 0x477   :  { %v1017_v57 = vadd.f32 %v1008_v11, %v961_v50  ;;  %v960_v40 = vadd.f32 %v943_v39, %v872_v38  ;;  %1042 = vrot.lane.b32.xlu0 %v1014_v52, %s1407_s24 }
 0x479   :  { %v1016_v58 = vadd.f32 %v1003_v48, %v960_v40  ;;  %1055 = vrot.lane.b32.xlu1 %v1017_v57, %s1408_s25 }
 0x47b   :  { %1053 = vrot.lane.b32.xlu0 %v1016_v58, %s1408_s25 }
 0x4df   :  { %v1023_v28 = vpop.permute.xlu1 %1022 }
 0x4e0   :  { %1028 = vst.msk [vmem:[#allocation2 + $0x8] sm:$0xff] %vm1026_vm7, %v1023_v28 }
 0x4e1   :  { %v1021_v41 = vpop.permute.xlu0 %1020 }
 0x4e2   :  { %1027 = vst.msk [vmem:[#allocation2] sm:$0xff] %vm1026_vm7, %v1021_v41 }
 0x4e3   :  { %v1034_v29 = vpop.permute.xlu1 %1033 }
 0x4e4   :  { %1039 = vst.msk [vmem:[#allocation2 + $0x8] sm:$0xff] %vm1037_vm8, %v1034_v29 }
 0x4e5   :  { %v1032_v59 = vpop.permute.xlu0 %1031 }
 0x4e6   :  { %1038 = vst.msk [vmem:[#allocation2] sm:$0xff] %vm1037_vm8, %v1032_v59 }
 0x4e7   :  { %v1045_v60 = vpop.permute.xlu1 %1044 }
 0x4e8   :  { %1050 = vst.msk [vmem:[#allocation2 + $0x8] sm:$0xff] %vm1048_vm9, %v1045_v60 }
 0x4e9   :  { %v1043_v61 = vpop.permute.xlu0 %1042 }
 0x4ea   :  { %1049 = vst.msk [vmem:[#allocation2] sm:$0xff] %vm1048_vm9, %v1043_v61 }
 0x4eb   :  { %v1056_v43 = vpop.permute.xlu1 %1055 }
 0x4ec   :  { %1061 = vst.msk [vmem:[#allocation2 + $0x8] sm:$0xff] %vm1059_vm10, %v1056_v43 }
 0x4ed   :  { %v1054_v62 = vpop.permute.xlu0 %1053 }
 0x4ee   :  { %1060 = vst.msk [vmem:[#allocation2] sm:$0xff] %vm1059_vm10, %v1054_v62 }
 0x4ef   :  { %1386 = shalt.err (!%p1383_p4)
}
 0x4f0   :  { %s1410_s29 = smov 128   ;;  %s1411_s30 = smov 8  }
 0x4f1   :  { %1073 = dma.vmem_to_hbm [thread:$0]  %s1068_s27, 256, %s2076_s4, [#allocation3], %s1410_s29, %s1410_s29, %s1411_s30  }
 0x4f2   :  { %1395 = dma.done.wait [#allocation3], 256  }
 0x4f3   :  { %1396 = vsyncadd [#allocation3], 4294967040 }
 0x4f4   :  { %1077 = vsyncpa [#allocation3], 1 }

</bundles_post_ra>
